<compile_context>
chip_gen: v7x
topology: tpu7x:2x2x1
jax: 0.10.0
libtpu: 0.0.40
codegen_flags: <defaults>
</compile_context>

<pallas_src>
import functools

import jax
import jax.numpy as jnp
from jax.experimental import pallas as pl
from jax.experimental.pallas import tpu as pltpu

LANE = 128
VMEM_LIMIT_BYTES = 48 * 1024 * 1024       # <= v7x physical 64 MiB, > defaults
RESIDENT_BUDGET_BYTES = 40 * 1024 * 1024  # keep headroom under the limit


def _round_up(v, m):
    return ((v + m - 1) // m) * m


# ----------------------------- Pallas kernels -------------------------------

def resident_gcn3_kernel(a_ref, x_ref, w_ref, b_ref, o_ref):
    """Fully VMEM-resident fused 3-layer GCN (grid-less).

    a_ref: (Np, Np) bf16   x_ref: (Np, 128) bf16
    w_ref: (3, 128, 128) bf16   b_ref: (3, 1, 128) f32   o_ref: (Np, 128) f32
    """
    a = a_ref[...]
    h = x_ref[...]
    t = None
    for l in range(3):                       # static unroll over layers
        # Feature transform then aggregation, both on the MXU (f32 accumulate).
        t = jnp.dot(h, w_ref[l], preferred_element_type=jnp.float32)
        t = jnp.dot(a, t.astype(a.dtype),
                    preferred_element_type=jnp.float32) + b_ref[l]
        if l < 2:
            # TODO(synk): dropout(p=0.3) between layers is identity at inference.
            h = jnp.maximum(t, 0.0).astype(x_ref.dtype)   # keep bf16 on-chip
    o_ref[...] = t.astype(o_ref.dtype)


def tiled_gcn3_kernel(a_ref, x_ref, w_ref, b_ref, o_ref, h_ref, *, tm):
    """Row-tiled fused 3-layer GCN. grid = (layer, row_tile), layer outermost.

    a_ref: (tm, Np) bf16 row block of A_hat (streamed)
    x_ref: (Np, 128) bf16 (VMEM-resident)
    w_ref: (1, 128, 128) bf16 / b_ref: (1, 1, 128) f32 (selected by layer)
    o_ref: (tm, 128) f32
    h_ref: (2, Np, 128) bf16 ping-pong scratch holding the layer inputs/outputs.
    """
    l = pl.program_id(0)
    i = pl.program_id(1)

    @pl.when(jnp.logical_and(l == 0, i == 0))
    def _():
        h_ref[0] = x_ref[...]                # seed layer-0 input once

    cur = l % 2                              # l=0,1,2 -> read h[0], h[1], h[0]
    nxt = (l + 1) % 2

    h_in = h_ref[cur]                                            # (Np, 128) bf16
    # Aggregation-first: (A_tile @ h) @ W == A_tile @ (h @ W), same FLOPs.
    agg = jnp.dot(a_ref[...], h_in, preferred_element_type=jnp.float32)
    t = jnp.dot(agg.astype(h_ref.dtype), w_ref[0],
                preferred_element_type=jnp.float32) + b_ref[0]
    t = jnp.where(l < 2, jnp.maximum(t, 0.0), t)                  # relu on 1,2

    row = pl.multiple_of(i * tm, tm)
    h_ref[nxt, pl.ds(row, tm), :] = t.astype(h_ref.dtype)

    @pl.when(l == 2)
    def _():
        o_ref[...] = t.astype(o_ref.dtype)


# ----------------------------- wrappers --------------------------------------

def _cost(n_pad, f_pad, a_bytes, x_bytes, w_bytes, b_bytes, a_passes):
    flops = 3 * (2 * n_pad * n_pad * f_pad + 2 * n_pad * f_pad * f_pad)
    bytes_accessed = (a_passes * a_bytes + x_bytes + w_bytes + b_bytes
                      + n_pad * f_pad * 4)
    return pl.CostEstimate(flops=flops, transcendentals=0,
                           bytes_accessed=bytes_accessed)


@jax.jit
def _resident_forward(a_hat, x_p, w_stack, b_stack):
    n_pad, f_pad = x_p.shape
    vmem = lambda: pl.BlockSpec(memory_space=pltpu.MemorySpace.VMEM)
    ce = _cost(n_pad, f_pad,
               a_hat.size * a_hat.dtype.itemsize,
               x_p.size * x_p.dtype.itemsize,
               w_stack.size * w_stack.dtype.itemsize,
               b_stack.size * b_stack.dtype.itemsize, a_passes=1)
    return pl.pallas_call(
        resident_gcn3_kernel,
        out_shape=jax.ShapeDtypeStruct((n_pad, f_pad), jnp.float32),
        in_specs=[vmem() for _ in range(4)],
        out_specs=vmem(),
        compiler_params=pltpu.CompilerParams(
            vmem_limit_bytes=VMEM_LIMIT_BYTES),
        cost_estimate=ce,
    )(a_hat, x_p, w_stack, b_stack)


@functools.partial(jax.jit, static_argnames=("tm",))
def _tiled_forward(a_hat, x_p, w_stack, b_stack, *, tm):
    n_pad, f_pad = x_p.shape
    nt = n_pad // tm
    ce = _cost(n_pad, f_pad,
               a_hat.size * a_hat.dtype.itemsize,
               x_p.size * x_p.dtype.itemsize,
               w_stack.size * w_stack.dtype.itemsize,
               b_stack.size * b_stack.dtype.itemsize, a_passes=3)
    # TODO(synk): with the shared ping-pong scratch, the row-tile axis must stay
    # "arbitrary"; exploiting v7x's 2 TCs would need per-layer calls instead.
    return pl.pallas_call(
        functools.partial(tiled_gcn3_kernel, tm=tm),
        out_shape=jax.ShapeDtypeStruct((n_pad, f_pad), jnp.float32),
        grid_spec=pltpu.PrefetchScalarGridSpec(
            num_scalar_prefetch=0,
            grid=(3, nt),
            in_specs=[
                pl.BlockSpec((tm, n_pad), lambda l, i: (i, 0)),       # A rows
                pl.BlockSpec((n_pad, f_pad), lambda l, i: (0, 0)),    # x (res.)
                pl.BlockSpec((1, f_pad, f_pad), lambda l, i: (l, 0, 0)),
                pl.BlockSpec((1, 1, f_pad), lambda l, i: (l, 0, 0)),
            ],
            out_specs=pl.BlockSpec((tm, f_pad), lambda l, i: (i, 0)),
            scratch_shapes=[pltpu.VMEM((2, n_pad, f_pad), x_p.dtype)],
        ),
        compiler_params=pltpu.CompilerParams(
            dimension_semantics=("arbitrary", "arbitrary"),
            vmem_limit_bytes=VMEM_LIMIT_BYTES),
        cost_estimate=ce,
    )(a_hat, x_p, w_stack, b_stack)


# ----------------------------- static prep (hoisted) -------------------------

def _pad2d(a, rows, cols):
    r, c = a.shape
    return jnp.pad(a, ((0, rows - r), (0, cols - c)))


def _pad1d(a, n):
    return jnp.pad(a, (0, n - a.shape[0]))


def build_normalized_adjacency(edge_index, num_nodes):
    """Dense GCN-normalized adjacency: D^{-1/2}(A + I)D^{-1/2}.

    edge_index: (2, E) [src; dst]; messages flow src -> dst so A[dst, src] = 1.
    Duplicate edges are summed (matches message passing with repeated edges).
    """
    src, dst = edge_index[0], edge_index[1]
    a = jnp.zeros((num_nodes, num_nodes), jnp.float32).at[dst, src].add(1.0)
    a = a + jnp.eye(num_nodes, dtype=jnp.float32)      # self loops
    deg = jnp.sum(a, axis=1)
    dis = jnp.where(deg > 0, 1.0 / jnp.sqrt(deg), 0.0)
    return dis[:, None] * a * dis[None, :]


def prepare_static_inputs(x, edge_index, params, compute_dtype=jnp.bfloat16,
                          force_tiled=False, tm=256):
    """One-time prep: normalized bf16 adjacency, lane-padded/stacked weights,
    and the resident-vs-streamed decision."""
    n = x.shape[0]
    fp = LANE                                          # all feature dims -> 128
    a = build_normalized_adjacency(edge_index, n)

    (w1, b1), (w2, b2), (w3, b3) = params
    pad_w = lambda w: _pad2d(w, fp, fp).astype(compute_dtype)
    pad_b = lambda b: _pad1d(b, fp).reshape(1, fp).astype(jnp.float32)
    w_stack = jnp.stack([pad_w(w1), pad_w(w2), pad_w(w3)])   # (3,128,128) bf16
    b_stack = jnp.stack([pad_b(b1), pad_b(b2), pad_b(b3)])   # (3,1,128)   f32

    isz = jnp.dtype(compute_dtype).itemsize
    n_res = _round_up(n, 8)
    resident_bytes = (n_res * n_res * isz + n_res * fp * isz
                      + w_stack.size * isz + b_stack.size * 4
                      + n_res * fp * 4)
    tiled = bool(force_tiled) or resident_bytes > RESIDENT_BUDGET_BYTES
    n_pad = _round_up(n, tm) if tiled else n_res

    a_p = _pad2d(a, n_pad, n_pad).astype(compute_dtype)
    x_p = _pad2d(x.astype(jnp.float32), n_pad, fp).astype(compute_dtype)
    return dict(a_hat=a_p, x_p=x_p, w=w_stack, b=b_stack,
                tiled=tiled, tm=tm, num_nodes=n)


def init_params(key, in_channels, hidden_channels, out_channels):
    """Glorot-uniform weights; small random biases (nonzero to exercise the
    bias-add path — GCNConv's forward supports any bias)."""
    dims = [
        (in_channels, hidden_channels),          # conv1
        (hidden_channels, hidden_channels * 2),  # conv2
        (hidden_channels * 2, out_channels),     # conv3
    ]
    params = []
    keys = jax.random.split(key, len(dims))
    for k, (fi, fo) in zip(keys, dims):
        kw, kb = jax.random.split(k)
        limit = jnp.sqrt(6.0 / (fi + fo))
        w = jax.random.uniform(kw, (fi, fo), jnp.float32, -limit, limit)
        b = 0.1 * jax.random.normal(kb, (fo,), jnp.float32)
        params.append((w, b))
    return params


def enhanced_link_predictor_forward(prepared, out_channels):
    """Pallas implementation of EnhancedLinkPredictor.forward (hot path)."""
    if prepared["tiled"]:
        out = _tiled_forward(prepared["a_hat"], prepared["x_p"],
                             prepared["w"], prepared["b"], tm=prepared["tm"])
    else:
        out = _resident_forward(prepared["a_hat"], prepared["x_p"],
                                prepared["w"], prepared["b"])
    return out[:prepared["num_nodes"], :out_channels]


# Pure-JAX f32 reference for sanity checks.
def _reference_forward(x, edge_index, params):
    hi = jax.lax.Precision.HIGHEST
    a_hat = build_normalized_adjacency(edge_index, x.shape[0])
    (w1, b1), (w2, b2), (w3, b3) = params
    h = jnp.maximum(jnp.dot(a_hat, jnp.dot(x, w1, precision=hi), precision=hi) + b1, 0.0)
    h = jnp.maximum(jnp.dot(a_hat, jnp.dot(h, w2, precision=hi), precision=hi) + b2, 0.0)
    return jnp.dot(a_hat, jnp.dot(h, w3, precision=hi), precision=hi) + b3


if __name__ == "__main__":
    # Shapes implied by the module's data prep:
    # in_channels = 3 + len(capabilities) + len(industries) + len(capabilities)
    #             = 3 + 12 + 10 + 12 = 37
    in_channels = 37
    hidden_channels = 32
    out_channels = 16

    key = jax.random.PRNGKey(0)
    k_p, k_g1, k_g2 = jax.random.split(key, 3)
    params = init_params(k_p, in_channels, hidden_channels, out_channels)

    def make_graph(k, num_nodes, num_edges):
        k_x, k_s, k_d = jax.random.split(k, 3)
        xv = jax.random.normal(k_x, (num_nodes, in_channels), jnp.float32)
        src = jax.random.randint(k_s, (num_edges,), 0, num_nodes)
        dst = (src + 1 + jax.random.randint(k_d, (num_edges,), 0,
                                            num_nodes - 1)) % num_nodes
        return xv, jnp.stack([src, dst], axis=0).astype(jnp.int32)

    # --- test 1: toy graph (N=16) -> grid-less VMEM-resident path -----------
    x1, ei1 = make_graph(k_g1, 16, 48)
    prep1 = prepare_static_inputs(x1, ei1, params)
    assert not prep1["tiled"]
    out1 = jax.block_until_ready(enhanced_link_predictor_forward(prep1, out_channels))
    ref1 = _reference_forward(x1, ei1, params)
    assert out1.shape == (16, out_channels), out1.shape
    assert jnp.allclose(out1, ref1, atol=8e-2, rtol=5e-2), "resident path mismatch"

    # --- test 2: larger graph (N=256), force the row-tiled streaming path ---
    x2, ei2 = make_graph(k_g2, 256, 1024)
    prep2 = prepare_static_inputs(x2, ei2, params, force_tiled=True, tm=128)
    assert prep2["tiled"]
    out2 = jax.block_until_ready(enhanced_link_predictor_forward(prep2, out_channels))
    ref2 = _reference_forward(x2, ei2, params)
    assert out2.shape == (256, out_channels), out2.shape
    assert jnp.allclose(out2, ref2, atol=8e-2, rtol=5e-2), "tiled path mismatch"

    print("KERNEL_OK")
</pallas_src>

<mosaic_0001>
module attributes {stable_mosaic.version = 11 : i64} {
  func.func @resident_gcn3_kernel(%arg0: memref<16x16xbf16, #tpu.memory_space<vmem>>, %arg1: memref<16x128xbf16, #tpu.memory_space<vmem>>, %arg2: memref<3x128x128xbf16, #tpu.memory_space<vmem>>, %arg3: memref<3x1x128xf32, #tpu.memory_space<vmem>>, %arg4: memref<16x128xf32, #tpu.memory_space<vmem>>) attributes {dimension_semantics = [], scalar_prefetch = 0 : i64, scratch_operands = 0 : i64, tpu.core_type = #tpu.core_type<tc>} {
    %c0 = arith.constant 0 : index
    %c0_0 = arith.constant 0 : index
    %0 = vector.load %arg0[%c0, %c0_0] : memref<16x16xbf16, #tpu.memory_space<vmem>>, vector<16x16xbf16>
    %c0_1 = arith.constant 0 : index
    %c0_2 = arith.constant 0 : index
    %1 = vector.load %arg1[%c0_1, %c0_2] : memref<16x128xbf16, #tpu.memory_space<vmem>>, vector<16x128xbf16>
    %c0_3 = arith.constant 0 : index
    %c0_4 = arith.constant 0 : index
    %c0_5 = arith.constant 0 : index
    %2 = vector.load %arg2[%c0_3, %c0_4, %c0_5] : memref<3x128x128xbf16, #tpu.memory_space<vmem>>, vector<1x128x128xbf16>
    %3 = vector.shape_cast %2 : vector<1x128x128xbf16> to vector<128x128xbf16>
    %cst = arith.constant dense<0.000000e+00> : vector<16x128xf32>
    %4 = tpu.matmul %1, %3, %cst {dimension_numbers = #tpu.dot_dimension_numbers<[1], [0], [0], [1], [0, 0, 1, 1], [], []>} : vector<16x128xbf16>, vector<128x128xbf16>, vector<16x128xf32> -> vector<16x128xf32>
    %5 = arith.truncf %4 : vector<16x128xf32> to vector<16x128xbf16>
    %cst_6 = arith.constant dense<0.000000e+00> : vector<16x128xf32>
    %6 = tpu.matmul %0, %5, %cst_6 {dimension_numbers = #tpu.dot_dimension_numbers<[1], [0], [0], [1], [0, 0, 1, 1], [], []>} : vector<16x16xbf16>, vector<16x128xbf16>, vector<16x128xf32> -> vector<16x128xf32>
    %c0_7 = arith.constant 0 : index
    %c0_8 = arith.constant 0 : index
    %c0_9 = arith.constant 0 : index
    %7 = vector.load %arg3[%c0_7, %c0_8, %c0_9] : memref<3x1x128xf32, #tpu.memory_space<vmem>>, vector<1x1x128xf32>
    %8 = vector.shape_cast %7 : vector<1x1x128xf32> to vector<1x128xf32>
    %9 = vector.broadcast %8 : vector<1x128xf32> to vector<16x128xf32>
    %10 = arith.addf %6, %9 : vector<16x128xf32>
    %cst_10 = arith.constant 0.000000e+00 : f32
    %11 = vector.broadcast %cst_10 : f32 to vector<16x128xf32>
    %12 = arith.maximumf %10, %11 : vector<16x128xf32>
    %13 = arith.truncf %12 : vector<16x128xf32> to vector<16x128xbf16>
    %c1 = arith.constant 1 : index
    %c0_11 = arith.constant 0 : index
    %c0_12 = arith.constant 0 : index
    %14 = vector.load %arg2[%c1, %c0_11, %c0_12] : memref<3x128x128xbf16, #tpu.memory_space<vmem>>, vector<1x128x128xbf16>
    %15 = vector.shape_cast %14 : vector<1x128x128xbf16> to vector<128x128xbf16>
    %cst_13 = arith.constant dense<0.000000e+00> : vector<16x128xf32>
    %16 = tpu.matmul %13, %15, %cst_13 {dimension_numbers = #tpu.dot_dimension_numbers<[1], [0], [0], [1], [0, 0, 1, 1], [], []>} : vector<16x128xbf16>, vector<128x128xbf16>, vector<16x128xf32> -> vector<16x128xf32>
    %17 = arith.truncf %16 : vector<16x128xf32> to vector<16x128xbf16>
    %cst_14 = arith.constant dense<0.000000e+00> : vector<16x128xf32>
    %18 = tpu.matmul %0, %17, %cst_14 {dimension_numbers = #tpu.dot_dimension_numbers<[1], [0], [0], [1], [0, 0, 1, 1], [], []>} : vector<16x16xbf16>, vector<16x128xbf16>, vector<16x128xf32> -> vector<16x128xf32>
    %c1_15 = arith.constant 1 : index
    %c0_16 = arith.constant 0 : index
    %c0_17 = arith.constant 0 : index
    %19 = vector.load %arg3[%c1_15, %c0_16, %c0_17] : memref<3x1x128xf32, #tpu.memory_space<vmem>>, vector<1x1x128xf32>
    %20 = vector.shape_cast %19 : vector<1x1x128xf32> to vector<1x128xf32>
    %21 = vector.broadcast %20 : vector<1x128xf32> to vector<16x128xf32>
    %22 = arith.addf %18, %21 : vector<16x128xf32>
    %cst_18 = arith.constant 0.000000e+00 : f32
    %23 = vector.broadcast %cst_18 : f32 to vector<16x128xf32>
    %24 = arith.maximumf %22, %23 : vector<16x128xf32>
    %25 = arith.truncf %24 : vector<16x128xf32> to vector<16x128xbf16>
    %c2 = arith.constant 2 : index
    %c0_19 = arith.constant 0 : index
    %c0_20 = arith.constant 0 : index
    %26 = vector.load %arg2[%c2, %c0_19, %c0_20] : memref<3x128x128xbf16, #tpu.memory_space<vmem>>, vector<1x128x128xbf16>
    %27 = vector.shape_cast %26 : vector<1x128x128xbf16> to vector<128x128xbf16>
    %cst_21 = arith.constant dense<0.000000e+00> : vector<16x128xf32>
    %28 = tpu.matmul %25, %27, %cst_21 {dimension_numbers = #tpu.dot_dimension_numbers<[1], [0], [0], [1], [0, 0, 1, 1], [], []>} : vector<16x128xbf16>, vector<128x128xbf16>, vector<16x128xf32> -> vector<16x128xf32>
    %29 = arith.truncf %28 : vector<16x128xf32> to vector<16x128xbf16>
    %cst_22 = arith.constant dense<0.000000e+00> : vector<16x128xf32>
    %30 = tpu.matmul %0, %29, %cst_22 {dimension_numbers = #tpu.dot_dimension_numbers<[1], [0], [0], [1], [0, 0, 1, 1], [], []>} : vector<16x16xbf16>, vector<16x128xbf16>, vector<16x128xf32> -> vector<16x128xf32>
    %c2_23 = arith.constant 2 : index
    %c0_24 = arith.constant 0 : index
    %c0_25 = arith.constant 0 : index
    %31 = vector.load %arg3[%c2_23, %c0_24, %c0_25] : memref<3x1x128xf32, #tpu.memory_space<vmem>>, vector<1x1x128xf32>
    %32 = vector.shape_cast %31 : vector<1x1x128xf32> to vector<1x128xf32>
    %33 = vector.broadcast %32 : vector<1x128xf32> to vector<16x128xf32>
    %34 = arith.addf %30, %33 : vector<16x128xf32>
    %c0_26 = arith.constant 0 : index
    %c0_27 = arith.constant 0 : index
    %35 = vector.load %arg4[%c0_26, %c0_27] : memref<16x128xf32, #tpu.memory_space<vmem>>, vector<16x128xf32>
    tpu.vector_store %arg4[%c0_26, %c0_27], %34 {strides = array<i32>} : memref<16x128xf32, #tpu.memory_space<vmem>>, vector<16x128xf32>,
    return
  }
}

</mosaic_0001>

<bundles_post_ra>
// kernel: _resident_forward.1
= control target key start
LH: loop header
LB: loop body
LE: loop exit
PB: predicated region body
PF: predicated region fallthrough
CT: control target
= control target key end

     0   :  { %9 = vsyncpa [#allocation3], 0  ;;  %s1001_s0 = inlined_call_operand.hbm [shape: bf16[16,16], index: 0, kind: input, shape index: {}]   ;;  %s1002_s1 = inlined_call_operand.hbm [shape: bf16[16,128], index: 1, kind: input, shape index: {}]   ;;  %s1003_s2 = inlined_call_operand.hbm [shape: bf16[3,128,128], index: 2, kind: input, shape index: {}]   ;;  %s1004_s3 = inlined_call_operand.vmem [shape: f32[3,1,128], index: 3, kind: input, shape index: {}]   ;;  %s1005_s4 = inlined_call_operand.hbm [shape: f32[16,128], index: 4, kind: output, shape index: {}]  }
   0x1   :  { %10 = vsyncpa [#allocation6], 0 }
   0x2   :  { %11 = vsyncpa [#allocation4], 0  ;;  %s846_s15 = smov [#allocation5]   ;;  %s847_s17 = smov [#allocation2]  }
   0x3   :  { %s29_s16 = sshll.u32 %s846_s15, 4  ;;  %s17_s18 = sshll.u32 %s847_s17, 4  ;;  %s30_s16 = int_to_ptr.vmem [resolvable:$true] %s29_s16  ;;  %s881_s18 = int_to_ptr.vmem [resolvable:$true] %s17_s18 }
   0x4   :  { %s752_s21 = scalar_lea.hbm %s1002_s1, 128 }
   0x5   :  { %p753_p0 = scmp.ne.s32.totalorder %s1002_s1, %s752_s21  ;;  %p756_p1 = scmp.lt.u32.totalorder %s752_s21, %s1002_s1 }
   0x7   :  { %p758_p2 = pnand %p756_p1, %p753_p0 }
   0x9   :  { %761 = shalt.err (!%p758_p2)
}
   0xa   :  { %s762_s26 = scalar_lea.vmem %s30_s16, 128  ;;  %p767_p4 = scmp.lt.s32.totalorder %s30_s16, %s30_s16 }
   0xb   :  { %p763_p3 = scmp.ne.s32.totalorder %s30_s16, %s762_s26  ;;  %p768_p5 = scmp.lt.s32.totalorder %s762_s26, %s762_s26 }
   0xd   :  { %p769_p6 = por %p768_p5, %p767_p4 }
   0xf   :  { %p770_p7 = pnand %p769_p6, %p763_p3 }
  0x11   :  { %773 = shalt.err (!%p770_p7)
}
  0x12   :  { %s848_s27 = smov 64   ;;  %s849_s28 = smov 4  }
  0x13   :  { %35 = dma.hbm_to_vmem [thread:$0]  %s1002_s1, 128, %s30_s16, [#allocation6], %s848_s27, %s848_s27, %s849_s28  }
  0x14   :  { %s774_s7 = scalar_lea.hbm %s1001_s0, 128 }
  0x15   :  { %p775_p8 = scmp.ne.s32.totalorder %s1001_s0, %s774_s7  ;;  %p778_p9 = scmp.lt.u32.totalorder %s774_s7, %s1001_s0 }
  0x17   :  { %p780_p10 = pnand %p778_p9, %p775_p8 }
  0x19   :  { %783 = shalt.err (!%p780_p10)
}
  0x1a   :  { %s784_s12 = scalar_lea.vmem %s881_s18, 128  ;;  %p789_p12 = scmp.lt.s32.totalorder %s881_s18, %s881_s18 }
  0x1b   :  { %p785_p11 = scmp.ne.s32.totalorder %s881_s18, %s784_s12  ;;  %p790_p13 = scmp.lt.s32.totalorder %s784_s12, %s784_s12 }
  0x1d   :  { %p791_p0 = por %p790_p13, %p789_p12 }
  0x1f   :  { %p792_p1 = pnand %p791_p0, %p785_p11 }
  0x21   :  { %795 = shalt.err (!%p792_p1)
}
  0x22   :  { %23 = dma.hbm_to_vmem [thread:$0]  %s1001_s0, 128, %s881_s18, [#allocation3], %s848_s27, %s848_s27, %s849_s28  }
  0x23   :  { %s850_s14 = smov [#allocation7]   ;;  %s796_s19 = scalar_lea.hbm %s1003_s2, 3072 }
  0x24   :  { %s41_s15 = sshll.u32 %s850_s14, 4  ;;  %p797_p2 = scmp.ne.s32.totalorder %s1003_s2, %s796_s19  ;;  %s42_s15 = int_to_ptr.vmem [resolvable:$true] %s41_s15 }
  0x25   :  { %p800_p3 = scmp.lt.u32.totalorder %s796_s19, %s1003_s2 }
  0x27   :  { %p802_p4 = pnand %p800_p3, %p797_p2 }
  0x29   :  { %805 = shalt.err (!%p802_p4)
}
  0x2a   :  { %s806_s24 = scalar_lea.vmem %s42_s15, 3072  ;;  %p811_p6 = scmp.lt.s32.totalorder %s42_s15, %s42_s15 }
  0x2b   :  { %p807_p5 = scmp.ne.s32.totalorder %s42_s15, %s806_s24  ;;  %p812_p7 = scmp.lt.s32.totalorder %s806_s24, %s806_s24 }
  0x2d   :  { %p813_p8 = por %p812_p7, %p811_p6 }
  0x2f   :  { %p814_p9 = pnand %p813_p8, %p807_p5 }
  0x31   :  { %817 = shalt.err (!%p814_p9)
}
  0x32   :  { %47 = dma.hbm_to_vmem [thread:$0]  %s1003_s2, 3072, %s42_s15, [#allocation6], %s848_s27, %s848_s27, %s849_s28  }
  0x33   :  { %840 = dma.done.wait [#allocation3], 128  }
  0x34   :  { %841 = vsyncadd [#allocation3], 4294967168 }
  0x35   :  { %842 = dma.done.wait [#allocation6], 3200  }
  0x36   :  { %843 = vsyncadd [#allocation6], 4294964096  ;;  %v851_v0 = vmov 0.0   ;;  %vm852_vm0 = vmmov 0   ;;  %v726_v1 = vld [vmem:[#allocation7] sm:$0xff]   ;;  %v727_v2 = vld [vmem:[#allocation7 + $0x8] sm:$0xff]  }
  0x37   :  { %638 = vmatprep.subr.bf16.mxu0 %v851_v0  ;;  %654 = vmatprep.mubr.msk.bf16.mxu0 %vm852_vm0, %v851_v0  ;;  %v728_v3 = vld [vmem:[#allocation7 + $0x10] sm:$0xff]   ;;  %v729_v4 = vld [vmem:[#allocation7 + $0x18] sm:$0xff]   ;;  %v730_v5 = vld [vmem:[#allocation7 + $0x20] sm:$0xff]   ;;  %vm188_vm1 = vcmask 130048   ;;  %s853_s30 = smov [#allocation8]  }
  0x38   :  { %664 = vmatprep.subr.bf16.mxu1 %v851_v0  ;;  %680 = vmatprep.mubr.msk.bf16.mxu1 %vm852_vm0, %v851_v0  ;;  %v731_v6 = vld [vmem:[#allocation7 + $0x28] sm:$0xff]   ;;  %v732_v7 = vld [vmem:[#allocation7 + $0x30] sm:$0xff]   ;;  %v733_v8 = vld [vmem:[#allocation7 + $0x38] sm:$0xff]   ;;  %s558_s5 = sshll.u32 %s853_s30, 4  ;;  %s559_s5 = int_to_ptr.vmem [resolvable:$true] %s558_s5 }
  0x39   :  { %639 = vmatpush3.bf16.msra.mxu0 %v726_v1  ;;  %v734_v9 = vld [vmem:[#allocation5] sm:$0xff]   ;;  %v736_v10 = vld [vmem:[#allocation7 + $0x40] sm:$0xff]   ;;  %v737_v11 = vld [vmem:[#allocation7 + $0x48] sm:$0xff]   ;;  %s818_s6 = scalar_lea.vmem %s559_s5, 256  ;;  %p823_p11 = scmp.lt.s32.totalorder %s559_s5, %s559_s5 }
  0x3a   :  { %640 = vmatprep.subr.bf16.mxu0 %v851_v0  ;;  %665 = vmatpush3.bf16.msra.mxu1 %v736_v10  ;;  %v738_v12 = vld [vmem:[#allocation7 + $0x50] sm:$0xff]   ;;  %v739_v13 = vld [vmem:[#allocation7 + $0x58] sm:$0xff]   ;;  %v740_v14 = vld [vmem:[#allocation7 + $0x60] sm:$0xff]   ;;  %p819_p10 = scmp.ne.s32.totalorder %s559_s5, %s818_s6  ;;  %p824_p12 = scmp.lt.s32.totalorder %s818_s6, %s818_s6 }
  0x3b   :  { %666 = vmatprep.subr.bf16.mxu1 %v851_v0  ;;  %v741_v15 = vld [vmem:[#allocation7 + $0x68] sm:$0xff]   ;;  %v955_v21 = vld [vmem:[#allocation2] sm:$0xff]   ;;  %v743_v23 = vld [vmem:[#allocation7 + $0x78] sm:$0xff]  }
  0x3c   :  { %v742_v22 = vld [vmem:[#allocation7 + $0x70] sm:$0xff]   ;;  %v744_v34 = vld [vmem:[#allocation7 + $0x80] sm:$0xff]   ;;  %v745_v35 = vld [vmem:[#allocation7 + $0x88] sm:$0xff]   ;;  %p825_p13 = por %p824_p12, %p823_p11 }
  0x3d   :  { %641 = vmatpush3.bf16.msra.mxu0 %v727_v2  ;;  %v580_v24 = vld [vmem:[%s1004_s3] ss:$0 sm:$0xff]  ;;  %v747_v37 = vld [vmem:[#allocation7 + $0x98] sm:$0xff]   ;;  %v748_v38 = vld [vmem:[#allocation7 + $0xa0] sm:$0xff]  }
  0x3e   :  { %642 = vmatprep.subr.bf16.mxu0 %v851_v0  ;;  %667 = vmatpush3.bf16.msra.mxu1 %v737_v11  ;;  %v746_v36 = vld [vmem:[#allocation7 + $0x90] sm:$0xff]   ;;  %v749_v39 = vld [vmem:[#allocation7 + $0xa8] sm:$0xff]   ;;  %v751_v46 = vld [vmem:[#allocation7 + $0xb8] sm:$0xff]   ;;  %p826_p0 = pnand %p825_p13, %p819_p10 }
  0x3f   :  { %668 = vmatprep.subr.bf16.mxu1 %v851_v0  ;;  %v750_v45 = vld [vmem:[#allocation7 + $0xb0] sm:$0xff]  }
  0x40   :  { %v592_v47 = vld [vmem:[%s1004_s3 + $0x1] ss:$0 sm:$0xff]  ;;  %v603_v62 = vld [vmem:[%s1004_s3 + $0x2] ss:$0 sm:$0xff] }
  0x41   :  { %643 = vmatpush3.bf16.msra.mxu0 %v728_v3 }
  0x42   :  { %644 = vmatprep.subr.bf16.mxu0 %v851_v0  ;;  %669 = vmatpush3.bf16.msra.mxu1 %v738_v12 }
  0x43   :  { %670 = vmatprep.subr.bf16.mxu1 %v851_v0 }
  0x45   :  { %645 = vmatpush3.bf16.msra.mxu0 %v729_v4 }
  0x46   :  { %646 = vmatprep.subr.bf16.mxu0 %v851_v0  ;;  %671 = vmatpush3.bf16.msra.mxu1 %v739_v13 }
  0x47   :  { %672 = vmatprep.subr.bf16.mxu1 %v851_v0 }
  0x49   :  { %647 = vmatpush3.bf16.msra.mxu0 %v730_v5 }
  0x4a   :  { %648 = vmatprep.subr.bf16.mxu0 %v851_v0  ;;  %673 = vmatpush3.bf16.msra.mxu1 %v740_v14 }
  0x4b   :  { %674 = vmatprep.subr.bf16.mxu1 %v851_v0 }
  0x4d   :  { %649 = vmatpush3.bf16.msra.mxu0 %v731_v6 }
  0x4e   :  { %650 = vmatprep.subr.bf16.mxu0 %v851_v0  ;;  %675 = vmatpush3.bf16.msra.mxu1 %v741_v15 }
  0x4f   :  { %676 = vmatprep.subr.bf16.mxu1 %v851_v0 }
  0x51   :  { %651 = vmatpush3.bf16.msra.mxu0 %v732_v7 }
  0x52   :  { %652 = vmatprep.subr.bf16.mxu0 %v851_v0  ;;  %677 = vmatpush3.bf16.msra.mxu1 %v742_v22 }
  0x53   :  { %678 = vmatprep.subr.bf16.mxu1 %v851_v0 }
  0x55   :  { %653 = vmatpush3.bf16.msra.mxu0 %v733_v8 }
  0x56   :  { %658 = vmatprep.subr.bf16.mxu0 %v851_v0  ;;  %679 = vmatpush3.bf16.msra.mxu1 %v743_v23 }
  0x57   :  { %690 = vmatprep.subr.bf16.mxu1 %v851_v0 }
  0x58   :  { %655 = vmatmul.mubr.bf16.vlgmr.msra.gmra.mrb[0].mxu0 %v734_v9 }
  0x59   :  { %660 = vmatprep.mubr.msk.bf16.mxu0 %vm852_vm0, %v851_v0 }
 0x12b   :  { %v168_v16 = vpop.f32.mrb[0].mxu0 }
 0x12c   :  { %v656_v17 = vpop.f32.mrb[1].mxu0 }
 0x12d   :  { %v171_v18 = vpop.f32.mrb[2].mxu0 }
 0x12e   :  { %v175_v19 = vpack.c.bf16 %v171_v18, %v168_v16  ;;  %v657_v20 = vpop.f32.mrb[3].mxu0 }
 0x130   :  { %659 = vmatpush3.bf16.msra.mxu0 %v175_v19 }
 0x131   :  { %684 = vmatprep.subr.bf16.mxu0 %v851_v0 }
 0x133   :  { %661 = vmatmul.mubr.msk.bf16.vlgmr.msra.gmra.mrb[4].mxu0 %vm188_vm1, %v955_v21 }
 0x134   :  { %686 = vmatprep.mubr.msk.bf16.mxu0 %vm852_vm0, %v851_v0 }
 0x206   :  { %v226_v25 = vpop.f32.mrb[4].mxu0 }
 0x207   :  { %v227_v26 = vadd.f32 %v580_v24, %v226_v25  ;;  %v662_v27 = vpop.f32.mrb[5].mxu0 }
 0x208   :  { %v229_v28 = vpop.f32.mrb[6].mxu0 }
 0x209   :  { %v230_v29 = vadd.f32 %v580_v24, %v229_v28  ;;  %v663_v30 = vpop.f32.mrb[7].mxu0  ;;  %v233_v31 = vmax.f32 %v227_v26, 0.0 }
 0x20b   :  { %v234_v32 = vmax.f32 %v230_v29, 0.0 }
 0x20d   :  { %v235_v33 = vpack.c.bf16 %v234_v32, %v233_v31 }
 0x20f   :  { %681 = vmatmul.mubr.bf16.vlgmr.msra.gmra.mrb[0].mxu1 %v235_v33 }
 0x210   :  { %706 = vmatprep.mubr.msk.bf16.mxu1 %vm852_vm0, %v851_v0  ;;  %691 = vmatpush3.bf16.msra.mxu1 %v744_v34 }
 0x211   :  { %692 = vmatprep.subr.bf16.mxu1 %v851_v0 }
 0x214   :  { %693 = vmatpush3.bf16.msra.mxu1 %v745_v35 }
 0x215   :  { %694 = vmatprep.subr.bf16.mxu1 %v851_v0 }
 0x218   :  { %695 = vmatpush3.bf16.msra.mxu1 %v746_v36 }
 0x219   :  { %696 = vmatprep.subr.bf16.mxu1 %v851_v0 }
 0x21c   :  { %697 = vmatpush3.bf16.msra.mxu1 %v747_v37 }
 0x21d   :  { %698 = vmatprep.subr.bf16.mxu1 %v851_v0 }
 0x220   :  { %699 = vmatpush3.bf16.msra.mxu1 %v748_v38 }
 0x221   :  { %700 = vmatprep.subr.bf16.mxu1 %v851_v0 }
 0x224   :  { %701 = vmatpush3.bf16.msra.mxu1 %v749_v39 }
 0x225   :  { %702 = vmatprep.subr.bf16.mxu1 %v851_v0 }
 0x228   :  { %703 = vmatpush3.bf16.msra.mxu1 %v750_v45 }
 0x229   :  { %704 = vmatprep.subr.bf16.mxu1 %v851_v0 }
 0x22c   :  { %705 = vmatpush3.bf16.msra.mxu1 %v751_v46 }
 0x2e2   :  { %v335_v40 = vpop.f32.mrb[0].mxu1 }
 0x2e3   :  { %v682_v41 = vpop.f32.mrb[1].mxu1 }
 0x2e4   :  { %v338_v42 = vpop.f32.mrb[2].mxu1 }
 0x2e5   :  { %v342_v43 = vpack.c.bf16 %v338_v42, %v335_v40  ;;  %v683_v44 = vpop.f32.mrb[3].mxu1 }
 0x2e7   :  { %685 = vmatpush3.bf16.msra.mxu0 %v342_v43 }
 0x2e8   :  { %710 = vmatprep.subr.bf16.mxu0 %v851_v0 }
 0x2ea   :  { %687 = vmatmul.mubr.msk.bf16.vlgmr.msra.gmra.mrb[8].mxu0 %vm188_vm1, %v955_v21 }
 0x2eb   :  { %712 = vmatprep.mubr.msk.bf16.mxu0 %vm852_vm0, %v851_v0 }
 0x3bd   :  { %v385_v48 = vpop.f32.mrb[8].mxu0 }
 0x3be   :  { %v386_v49 = vadd.f32 %v592_v47, %v385_v48  ;;  %v688_v50 = vpop.f32.mrb[9].mxu0 }
 0x3bf   :  { %v388_v51 = vpop.f32.mrb[10].mxu0 }
 0x3c0   :  { %v389_v52 = vadd.f32 %v592_v47, %v388_v51  ;;  %v689_v53 = vpop.f32.mrb[11].mxu0  ;;  %v392_v54 = vmax.f32 %v386_v49, 0.0 }
 0x3c2   :  { %v393_v55 = vmax.f32 %v389_v52, 0.0 }
 0x3c4   :  { %v394_v56 = vpack.c.bf16 %v393_v55, %v392_v54 }
 0x3c6   :  { %707 = vmatmul.mubr.bf16.vlgmr.msra.gmra.mrb[4].mxu1 %v394_v56 }
 0x499   :  { %v494_v57 = vpop.f32.mrb[4].mxu1 }
 0x49a   :  { %v708_v58 = vpop.f32.mrb[5].mxu1 }
 0x49b   :  { %v497_v59 = vpop.f32.mrb[6].mxu1 }
 0x49c   :  { %v501_v60 = vpack.c.bf16 %v497_v59, %v494_v57  ;;  %v709_v61 = vpop.f32.mrb[7].mxu1 }
 0x49e   :  { %711 = vmatpush3.bf16.msra.mxu0 %v501_v60 }
 0x4a1   :  { %713 = vmatmul.mubr.msk.bf16.vlgmr.msra.gmra.mrb[12].mxu0 %vm188_vm1, %v955_v21 }
 0x574   :  { %v544_v63 = vpop.f32.mrb[12].mxu0 }
 0x575   :  { %v545_v0 = vadd.f32 %v603_v62, %v544_v63  ;;  %v714_v1 = vpop.f32.mrb[13].mxu0 }
 0x576   :  { %v547_v2 = vpop.f32.mrb[14].mxu0 }
 0x577   :  { %551 = vst [vmem:[#allocation8] sm:$0xff] %v545_v0  ;;  %v548_v3 = vadd.f32 %v603_v62, %v547_v2  ;;  %v715_v4 = vpop.f32.mrb[15].mxu0 }
 0x579   :  { %552 = vst [vmem:[#allocation8 + $0x8] sm:$0xff] %v548_v3 }
 0x57a   :  { %829 = shalt.err (!%p826_p0)
}
 0x57b   :  { %s830_s8 = scalar_lea.hbm %s1005_s4, 256 }
 0x57c   :  { %p831_p1 = scmp.ne.s32.totalorder %s1005_s4, %s830_s8  ;;  %p834_p2 = scmp.lt.u32.totalorder %s830_s8, %s1005_s4 }
 0x57e   :  { %p836_p3 = pnand %p834_p2, %p831_p1 }
 0x580   :  { %839 = shalt.err (!%p836_p3)
}
 0x581   :  { %s854_s1 = smov 128   ;;  %s855_s13 = smov 8  }
 0x582   :  { %564 = dma.vmem_to_hbm [thread:$0]  %s559_s5, 256, %s1005_s4, [#allocation4], %s854_s1, %s854_s1, %s855_s13  }
 0x583   :  { %844 = dma.done.wait [#allocation4], 256  }
 0x584   :  { %845 = vsyncadd [#allocation4], 4294967040 }
 0x585   :  { %568 = vsyncpa [#allocation3], 1 }
 0x586   :  { %569 = vsyncpa [#allocation6], 1 }
 0x587   :  { %570 = vsyncpa [#allocation4], 1 }

</bundles_post_ra>
